<compile_context>
chip_gen: v7x
topology: tpu7x:2x2x1
jax: 0.10.0
libtpu: 0.0.40
codegen_flags: <defaults>
</compile_context>

<pallas_src>
import functools

import jax
import jax.numpy as jnp
from jax.experimental import pallas as pl
from jax.experimental.pallas import tpu as pltpu


def _series_decomp_kernel(x_ref, res_ref, ma_ref, *, L, D, half, inv_k):
    x = x_ref[...]                                   # (Bt, L*D) f32, lane-dense
    LD = L * D

    # Zero-padded sliding-window sum, accumulated directly into the
    # moving-mean output block (no padded slab, no concatenate).
    ma_ref[...] = x                                  # tap j = 0
    for s in range(1, half + 1):
        n = (L - s) * D
        ma_ref[:, 0:n] += x[:, s * D:s * D + n]      # tap j = +s
        ma_ref[:, s * D:s * D + n] += x[:, 0:n]      # tap j = -s

    # Replicate-padding corrections for the first / last `half` time steps:
    # row l gains (half - l) extra copies of x[0] (resp. x[L-1]).
    x_first = x[:, 0:D]
    x_last = x[:, LD - D:LD]
    for l in range(half):
        c = jnp.float32(half - l)
        ma_ref[:, l * D:(l + 1) * D] += c * x_first
        ma_ref[:, LD - (l + 1) * D:LD - l * D] += c * x_last

    mm = ma_ref[...] * inv_k                         # single constant multiply
    ma_ref[...] = mm                                 # full-tile dense store
    res_ref[...] = x - mm                            # full-tile dense store


def _pick_batch_tile(B, LD, block_budget_bytes):
    """Largest Bt whose double-buffered footprint fits the VMEM budget."""
    bytes_per_row = LD * 4
    # x (2x double-buffer) + res (2x) + moving_mean (2x) + ~1 working copy.
    footprint_per_row = 7 * bytes_per_row
    bt = max(1, block_budget_bytes // footprint_per_row)
    bt = min(bt, B)
    # v7x megacore: keep >= 4 parallel grid steps when B is large enough,
    # but never shrink a block below 8 sublane rows just for step count.
    bt = min(bt, max(pl.cdiv(B, 4), 8))
    bt = min(bt, B)
    if bt < B and bt >= 8:
        bt = (bt // 8) * 8                           # sublane-aligned tile rows
    return bt


def series_decomp(x, kernel_size):
    """x: (B, L, D) float32. Returns (res, moving_mean), both (B, L, D)."""
    B, L, D = x.shape
    assert kernel_size % 2 == 1, "series_decomp expects an odd kernel_size"
    half = (kernel_size - 1) // 2
    assert half < L, "kernel_size too large for sequence length"

    x = x.astype(jnp.float32)
    LD = L * D
    xf = x.reshape(B, LD)                            # free reshape (contiguous)

    # Per-generation VMEM budget (v7x: 64 MiB/TC; v5e/v6e: 128 MiB).
    try:
        vmem_physical = int(pltpu.get_tpu_info().vmem_capacity_bytes)
    except Exception:
        vmem_physical = 64 * 1024 * 1024             # v7x-safe default
    vmem_limit = min(vmem_physical, 96 * 1024 * 1024)
    block_budget = int(vmem_limit * 0.65)            # headroom for compiler use

    bt = _pick_batch_tile(B, LD, block_budget)
    grid = (pl.cdiv(B, bt),)
    block = (bt, LD)

    kernel = functools.partial(
        _series_decomp_kernel,
        L=L, D=D, half=half, inv_k=1.0 / kernel_size)

    res_f, mm_f = pl.pallas_call(
        kernel,
        out_shape=(jax.ShapeDtypeStruct((B, LD), jnp.float32),
                   jax.ShapeDtypeStruct((B, LD), jnp.float32)),
        grid=grid,
        in_specs=[pl.BlockSpec(block, lambda i: (i, 0))],
        out_specs=(pl.BlockSpec(block, lambda i: (i, 0)),
                   pl.BlockSpec(block, lambda i: (i, 0))),
        compiler_params=pltpu.CompilerParams(
            dimension_semantics=("parallel",),
            vmem_limit_bytes=vmem_limit),
    )(xf)

    return res_f.reshape(B, L, D), mm_f.reshape(B, L, D)


def reference(x, kernel_size):
    """Pure-JAX reference mirroring the PyTorch forward."""
    half = (kernel_size - 1) // 2
    L = x.shape[1]
    front = jnp.repeat(x[:, :1, :], half, axis=1)
    end = jnp.repeat(x[:, -1:, :], half, axis=1)
    xp = jnp.concatenate([front, x, end], axis=1)     # (B, L + 2*half, D)
    mm = sum(xp[:, j:j + L, :] for j in range(kernel_size)) / kernel_size
    return x - mm, mm


if __name__ == "__main__":
    # Small shapes consistent with the module: batch=2, seq len=16, hidden=32,
    # decomposition kernel_size=5 (odd, as used by the series-decomp blocks).
    B, L, D = 2, 16, 32
    kernel_size = 5

    key = jax.random.PRNGKey(0)
    x = jax.random.normal(key, (B, L, D), dtype=jnp.float32)

    res, mm = series_decomp(x, kernel_size)
    res = jax.block_until_ready(res)
    mm = jax.block_until_ready(mm)

    res_ref, mm_ref = reference(x, kernel_size)
    assert res.shape == (B, L, D) and mm.shape == (B, L, D)
    assert jnp.allclose(mm, mm_ref, rtol=1e-5, atol=1e-5), "moving_mean mismatch"
    assert jnp.allclose(res, res_ref, rtol=1e-5, atol=1e-5), "res mismatch"

    print("KERNEL_OK")
</pallas_src>

<mosaic_0001>
module attributes {stable_mosaic.version = 11 : i64} {
  func.func @_series_decomp_kernel(%arg0: i32, %arg1: memref<2x512xf32, #tpu.memory_space<vmem>>, %arg2: memref<2x512xf32, #tpu.memory_space<vmem>>, %arg3: memref<2x512xf32, #tpu.memory_space<vmem>>) attributes {dimension_semantics = [#tpu.dimension_semantics<parallel>], iteration_bounds = array<i64: 1>, scalar_prefetch = 0 : i64, scratch_operands = 0 : i64, tpu.core_type = #tpu.core_type<tc>, window_params = [{transform_indices = @transform_0, window_bounds = array<i64: 2, 512>}, {transform_indices = @transform_1, window_bounds = array<i64: 2, 512>}, {transform_indices = @transform_2, window_bounds = array<i64: 2, 512>}]} {
    %c0 = arith.constant 0 : index
    %c0_0 = arith.constant 0 : index
    %0 = vector.load %arg1[%c0, %c0_0] : memref<2x512xf32, #tpu.memory_space<vmem>>, vector<2x512xf32>
    %c0_1 = arith.constant 0 : index
    %c0_2 = arith.constant 0 : index
    %1 = vector.load %arg3[%c0_1, %c0_2] : memref<2x512xf32, #tpu.memory_space<vmem>>, vector<2x512xf32>
    tpu.vector_store %arg3[%c0_1, %c0_2], %0 {strides = array<i32>} : memref<2x512xf32, #tpu.memory_space<vmem>>, vector<2x512xf32>,
    %c0_3 = arith.constant 0 : index
    %c0_4 = arith.constant 0 : index
    %2 = vector.load %arg3[%c0_3, %c0_4] : memref<2x512xf32, #tpu.memory_space<vmem>>, vector<2x480xf32>
    %3 = vector.extract_strided_slice %0 {offsets = [0, 32], sizes = [2, 480], strides = [1, 1]} : vector<2x512xf32> to vector<2x480xf32>
    %4 = arith.addf %2, %3 : vector<2x480xf32>
    %c0_5 = arith.constant 0 : index
    %c0_6 = arith.constant 0 : index
    %5 = vector.load %arg3[%c0_5, %c0_6] : memref<2x512xf32, #tpu.memory_space<vmem>>, vector<2x480xf32>
    tpu.vector_store %arg3[%c0_5, %c0_6], %4 {strides = array<i32>} : memref<2x512xf32, #tpu.memory_space<vmem>>, vector<2x480xf32>,
    %c0_7 = arith.constant 0 : index
    %c32 = arith.constant 32 : index
    %6 = vector.load %arg3[%c0_7, %c32] : memref<2x512xf32, #tpu.memory_space<vmem>>, vector<2x480xf32>
    %7 = vector.extract_strided_slice %0 {offsets = [0, 0], sizes = [2, 480], strides = [1, 1]} : vector<2x512xf32> to vector<2x480xf32>
    %8 = arith.addf %6, %7 : vector<2x480xf32>
    %c0_8 = arith.constant 0 : index
    %c32_9 = arith.constant 32 : index
    %9 = vector.load %arg3[%c0_8, %c32_9] : memref<2x512xf32, #tpu.memory_space<vmem>>, vector<2x480xf32>
    tpu.vector_store %arg3[%c0_8, %c32_9], %8 {strides = array<i32>} : memref<2x512xf32, #tpu.memory_space<vmem>>, vector<2x480xf32>,
    %c0_10 = arith.constant 0 : index
    %c0_11 = arith.constant 0 : index
    %10 = vector.load %arg3[%c0_10, %c0_11] : memref<2x512xf32, #tpu.memory_space<vmem>>, vector<2x448xf32>
    %11 = vector.extract_strided_slice %0 {offsets = [0, 64], sizes = [2, 448], strides = [1, 1]} : vector<2x512xf32> to vector<2x448xf32>
    %12 = arith.addf %10, %11 : vector<2x448xf32>
    %c0_12 = arith.constant 0 : index
    %c0_13 = arith.constant 0 : index
    %13 = vector.load %arg3[%c0_12, %c0_13] : memref<2x512xf32, #tpu.memory_space<vmem>>, vector<2x448xf32>
    tpu.vector_store %arg3[%c0_12, %c0_13], %12 {strides = array<i32>} : memref<2x512xf32, #tpu.memory_space<vmem>>, vector<2x448xf32>,
    %c0_14 = arith.constant 0 : index
    %c64 = arith.constant 64 : index
    %14 = vector.load %arg3[%c0_14, %c64] : memref<2x512xf32, #tpu.memory_space<vmem>>, vector<2x448xf32>
    %15 = vector.extract_strided_slice %0 {offsets = [0, 0], sizes = [2, 448], strides = [1, 1]} : vector<2x512xf32> to vector<2x448xf32>
    %16 = arith.addf %14, %15 : vector<2x448xf32>
    %c0_15 = arith.constant 0 : index
    %c64_16 = arith.constant 64 : index
    %17 = vector.load %arg3[%c0_15, %c64_16] : memref<2x512xf32, #tpu.memory_space<vmem>>, vector<2x448xf32>
    tpu.vector_store %arg3[%c0_15, %c64_16], %16 {strides = array<i32>} : memref<2x512xf32, #tpu.memory_space<vmem>>, vector<2x448xf32>,
    %18 = vector.extract_strided_slice %0 {offsets = [0, 0], sizes = [2, 32], strides = [1, 1]} : vector<2x512xf32> to vector<2x32xf32>
    %19 = vector.extract_strided_slice %0 {offsets = [0, 480], sizes = [2, 32], strides = [1, 1]} : vector<2x512xf32> to vector<2x32xf32>
    %c0_17 = arith.constant 0 : index
    %c0_18 = arith.constant 0 : index
    %20 = vector.load %arg3[%c0_17, %c0_18] : memref<2x512xf32, #tpu.memory_space<vmem>>, vector<2x32xf32>
    %cst = arith.constant 2.000000e+00 : f32
    %21 = vector.broadcast %cst : f32 to vector<2x32xf32>
    %22 = arith.mulf %21, %18 : vector<2x32xf32>
    %23 = arith.addf %20, %22 : vector<2x32xf32>
    %c0_19 = arith.constant 0 : index
    %c0_20 = arith.constant 0 : index
    %24 = vector.load %arg3[%c0_19, %c0_20] : memref<2x512xf32, #tpu.memory_space<vmem>>, vector<2x32xf32>
    tpu.vector_store %arg3[%c0_19, %c0_20], %23 {strides = array<i32>} : memref<2x512xf32, #tpu.memory_space<vmem>>, vector<2x32xf32>,
    %c0_21 = arith.constant 0 : index
    %c480 = arith.constant 480 : index
    %25 = vector.load %arg3[%c0_21, %c480] : memref<2x512xf32, #tpu.memory_space<vmem>>, vector<2x32xf32>
    %cst_22 = arith.constant 2.000000e+00 : f32
    %26 = vector.broadcast %cst_22 : f32 to vector<2x32xf32>
    %27 = arith.mulf %26, %19 : vector<2x32xf32>
    %28 = arith.addf %25, %27 : vector<2x32xf32>
    %c0_23 = arith.constant 0 : index
    %c480_24 = arith.constant 480 : index
    %29 = vector.load %arg3[%c0_23, %c480_24] : memref<2x512xf32, #tpu.memory_space<vmem>>, vector<2x32xf32>
    tpu.vector_store %arg3[%c0_23, %c480_24], %28 {strides = array<i32>} : memref<2x512xf32, #tpu.memory_space<vmem>>, vector<2x32xf32>,
    %c0_25 = arith.constant 0 : index
    %c32_26 = arith.constant 32 : index
    %30 = vector.load %arg3[%c0_25, %c32_26] : memref<2x512xf32, #tpu.memory_space<vmem>>, vector<2x32xf32>
    %cst_27 = arith.constant 1.000000e+00 : f32
    %31 = vector.broadcast %cst_27 : f32 to vector<2x32xf32>
    %32 = arith.mulf %31, %18 : vector<2x32xf32>
    %33 = arith.addf %30, %32 : vector<2x32xf32>
    %c0_28 = arith.constant 0 : index
    %c32_29 = arith.constant 32 : index
    %34 = vector.load %arg3[%c0_28, %c32_29] : memref<2x512xf32, #tpu.memory_space<vmem>>, vector<2x32xf32>
    tpu.vector_store %arg3[%c0_28, %c32_29], %33 {strides = array<i32>} : memref<2x512xf32, #tpu.memory_space<vmem>>, vector<2x32xf32>,
    %c0_30 = arith.constant 0 : index
    %c448 = arith.constant 448 : index
    %35 = vector.load %arg3[%c0_30, %c448] : memref<2x512xf32, #tpu.memory_space<vmem>>, vector<2x32xf32>
    %cst_31 = arith.constant 1.000000e+00 : f32
    %36 = vector.broadcast %cst_31 : f32 to vector<2x32xf32>
    %37 = arith.mulf %36, %19 : vector<2x32xf32>
    %38 = arith.addf %35, %37 : vector<2x32xf32>
    %c0_32 = arith.constant 0 : index
    %c448_33 = arith.constant 448 : index
    %39 = vector.load %arg3[%c0_32, %c448_33] : memref<2x512xf32, #tpu.memory_space<vmem>>, vector<2x32xf32>
    tpu.vector_store %arg3[%c0_32, %c448_33], %38 {strides = array<i32>} : memref<2x512xf32, #tpu.memory_space<vmem>>, vector<2x32xf32>,
    %c0_34 = arith.constant 0 : index
    %c0_35 = arith.constant 0 : index
    %40 = vector.load %arg3[%c0_34, %c0_35] : memref<2x512xf32, #tpu.memory_space<vmem>>, vector<2x512xf32>
    %cst_36 = arith.constant 2.000000e-01 : f32
    %41 = vector.broadcast %cst_36 : f32 to vector<2x512xf32>
    %42 = arith.mulf %40, %41 : vector<2x512xf32>
    %c0_37 = arith.constant 0 : index
    %c0_38 = arith.constant 0 : index
    %43 = vector.load %arg3[%c0_37, %c0_38] : memref<2x512xf32, #tpu.memory_space<vmem>>, vector<2x512xf32>
    tpu.vector_store %arg3[%c0_37, %c0_38], %42 {strides = array<i32>} : memref<2x512xf32, #tpu.memory_space<vmem>>, vector<2x512xf32>,
    %44 = arith.subf %0, %42 : vector<2x512xf32>
    %c0_39 = arith.constant 0 : index
    %c0_40 = arith.constant 0 : index
    %45 = vector.load %arg2[%c0_39, %c0_40] : memref<2x512xf32, #tpu.memory_space<vmem>>, vector<2x512xf32>
    tpu.vector_store %arg2[%c0_39, %c0_40], %44 {strides = array<i32>} : memref<2x512xf32, #tpu.memory_space<vmem>>, vector<2x512xf32>,
    return
  }
  func.func @transform_0(%arg0: i32) -> (i32, i32) {
    %c0_i32 = arith.constant 0 : i32
    %c0_i32_0 = arith.constant 0 : i32
    return %arg0, %c0_i32 : i32, i32
  }
  func.func @transform_1(%arg0: i32) -> (i32, i32) {
    %c0_i32 = arith.constant 0 : i32
    %c0_i32_0 = arith.constant 0 : i32
    return %arg0, %c0_i32 : i32, i32
  }
  func.func @transform_2(%arg0: i32) -> (i32, i32) {
    %c0_i32 = arith.constant 0 : i32
    %c0_i32_0 = arith.constant 0 : i32
    return %arg0, %c0_i32 : i32, i32
  }
}

</mosaic_0001>

<bundles_post_ra>
// kernel: tpu_custom_call.1
= control target key start
LH: loop header
LB: loop body
LE: loop exit
PB: predicated region body
PF: predicated region fallthrough
CT: control target
= control target key end

     0   :  { %8 = vsyncpa [#allocation3], 0  ;;  %s298_s0 = inlined_call_operand.hbm [shape: f32[2,512], index: 0, kind: input, shape index: {}]   ;;  %s299_s1 = inlined_call_operand.hbm [shape: f32[2,512], index: 1, kind: output, shape index: {0}]   ;;  %s300_s2 = inlined_call_operand.hbm [shape: f32[2,512], index: 2, kind: output, shape index: {1}]  }
   0x1   :  { %9 = vsyncpa [#allocation4], 0 }
   0x2   :  { %10 = vsyncpa [#allocation7], 0  ;;  %s216_s9 = smov [#allocation2]   ;;  %s144_s13 = scalar_lea.hbm %s298_s0, 128 }
   0x3   :  { %s17_s10 = sshll.u32 %s216_s9, 4  ;;  %p145_p0 = scmp.ne.s32.totalorder %s298_s0, %s144_s13  ;;  %s18_s10 = int_to_ptr.vmem [resolvable:$true] %s17_s10 }
   0x4   :  { %p148_p1 = scmp.lt.u32.totalorder %s144_s13, %s298_s0 }
   0x6   :  { %p150_p2 = pnand %p148_p1, %p145_p0 }
   0x8   :  { %153 = shalt.err (!%p150_p2)
}
   0x9   :  { %s154_s18 = scalar_lea.vmem %s18_s10, 128  ;;  %p159_p4 = scmp.lt.s32.totalorder %s18_s10, %s18_s10 }
   0xa   :  { %p155_p3 = scmp.ne.s32.totalorder %s18_s10, %s154_s18  ;;  %p160_p5 = scmp.lt.s32.totalorder %s154_s18, %s154_s18 }
   0xc   :  { %p161_p6 = por %p160_p5, %p159_p4 }
   0xe   :  { %p162_p7 = pnand %p161_p6, %p155_p3 }
  0x10   :  { %165 = shalt.err (!%p162_p7)
}
  0x11   :  { %20 = dma.hbm_to_vmem [thread:$0]  %s298_s0, 128, %s18_s10, [#allocation3]  }
  0x12   :  { %210 = dma.done.wait [#allocation3], 128  }
  0x13   :  { %211 = vsyncadd [#allocation3], 4294967168  ;;  %v249_v0 = vld [vmem:[#allocation2] sm:$0xff]  ;;  %s217_s21 = smov 32   ;;  %s218_s22 = smov 64   ;;  %vm35_vm0 = vcmask 1041408  }
  0x14   :  { %44 = vrot.lane.b32.xlu0 %v249_v0, %s217_s21  ;;  %25 = vst [vmem:[#allocation6] sm:$0xff] %v249_v0  ;;  %58 = vrot.lane.b32.xlu1 %v249_v0, %s218_s22  ;;  %s219_s23 = smov 96   ;;  %vm36_vm1 = vcmask 1043458   ;;  %vm38_vm3 = vcmask 1045508   ;;  %vm31_vm4 = vcmask 785408   ;;  %vm40_vm6 = vcmask 785414  }
  0x15   :  { %vm37_vm2 = vmor %vm36_vm1, %vm35_vm0  ;;  %vm51_vm8 = vcmask 1041664   ;;  %vm47_vm10 = vcmask 261120   ;;  %vm54_vm12 = vcmask 1047558   ;;  %vm61_vm14 = vcmask 523264   ;;  %s220_s0 = smov [#allocation6]   ;;  %s221_s25 = smov [#allocation5]  }
  0x16   :  { %vm257_vm5 = vmor %vm38_vm3, %vm37_vm2  ;;  %vm65_vm15 = vcmask 523270   ;;  %vm73_vm2 = vcmask 1041920   ;;  %v79_v21 = vmul.f32 2.0, %v249_v0  ;;  %s125_s24 = sshll.u32 %s220_s0, 4  ;;  %s115_s26 = sshll.u32 %s221_s25, 4  ;;  %s126_s24 = int_to_ptr.vmem [resolvable:$true] %s125_s24  ;;  %s116_s26 = int_to_ptr.vmem [resolvable:$true] %s115_s26 }
  0x17   :  { %vm41_vm7 = vmor %vm40_vm6, %vm257_vm5  ;;  %s166_s27 = scalar_lea.vmem %s126_s24, 128  ;;  %p171_p9 = scmp.lt.s32.totalorder %s126_s24, %s126_s24 }
  0x18   :  { %28 = vrot.lane.b32.xlu0 %v249_v0, %s219_s23  ;;  %vm52_vm9 = vmor %vm36_vm1, %vm51_vm8  ;;  %vm81_vm8 = vcmask 254976   ;;  %p167_p8 = scmp.ne.s32.totalorder %s126_s24, %s166_s27  ;;  %p172_p10 = scmp.lt.s32.totalorder %s166_s27, %s166_s27 }
  0x19   :  { %vm53_vm11 = vmor %vm38_vm3, %vm52_vm9 }
  0x1a   :  { %vm55_vm13 = vmor %vm54_vm12, %vm53_vm11  ;;  %p173_p11 = por %p172_p10, %p171_p9 }
  0x1b   :  { %vm66_vm0 = vmor %vm65_vm15, %vm257_vm5  ;;  %vm96_vm5 = vcmask 517376  }
  0x1c   :  { %p174_p12 = pnand %p173_p11, %p167_p8 }
  0x86   :  { %v45_v1 = vpop.permute.xlu0 %44  ;;  %v59_v12 = vpop.permute.xlu1 %58 }
  0x87   :  { %v46_v2 = vrot.slane %v45_v1, 6  ;;  %v60_v13 = vrot.slane %v59_v12, 2  ;;  %v69_v17 = vrot.slane %v59_v12, 6 }
  0x89   :  { %v85_v3 = vmul.f32 2.0, %v46_v2  ;;  %v48_v9 = vsel %vm47_vm10, %v46_v2, %v45_v1  ;;  %v62_v14 = vsel %vm61_vm14, %v59_v12, %v60_v13  ;;  %v70_v18 = vsel %vm61_vm14, %v69_v17, %v59_v12 }
  0x8a   :  { %v29_v5 = vpop.permute.xlu0 %28 }
  0x8b   :  { %v30_v6 = vrot.slane %v29_v5, 2  ;;  %87 = vrot.lane.b32.xlu1 %v85_v3, %s219_s23  ;;  %v99_v29 = vrot.slane %v29_v5, 6 }
  0x8d   :  { %v32_v7 = vsel %vm31_vm4, %v29_v5, %v30_v6  ;;  %vm74_vm4 = vmor %vm36_vm1, %vm73_vm2  ;;  %vm91_vm1 = vcmask 1042176  }
  0x8e   :  { %v34_v8 = vadd.f32 %v32_v7, %v249_v0  ;;  %vm75_vm6 = vmor %vm38_vm3, %vm74_vm4  ;;  %vm102_vm3 = vcmask 779776  }
  0x90   :  { %42 = vst.msk [vmem:[#allocation6] sm:$0xff] %vm41_vm7, %v34_v8  ;;  %vm76_vm7 = vmor %vm54_vm12, %vm75_vm6 }
  0x97   :  { %v43_v10 = vld [vmem:[#allocation6] sm:$0xff] }
  0x98   :  { %v50_v11 = vadd.f32 %v48_v9, %v43_v10 }
  0x9a   :  { %56 = vst.msk [vmem:[#allocation6] sm:$0xff] %vm55_vm13, %v50_v11 }
  0xa1   :  { %v57_v15 = vld [vmem:[#allocation6] sm:$0xff] }
  0xa2   :  { %v64_v16 = vadd.f32 %v62_v14, %v57_v15 }
  0xa4   :  { %67 = vst.msk [vmem:[#allocation6] sm:$0xff] %vm66_vm0, %v64_v16 }
  0xab   :  { %v68_v19 = vld [vmem:[#allocation6] sm:$0xff] }
  0xac   :  { %v72_v20 = vadd.f32 %v70_v18, %v68_v19 }
  0xae   :  { %77 = vst.msk [vmem:[#allocation6] sm:$0xff] %vm76_vm7, %v72_v20 }
  0xb5   :  { %v78_v22 = vld [vmem:[#allocation6] sm:$0x3]  ;;  %v83_v27 = vld [vmem:[#allocation6 + $0x6] sm:$0x3] }
  0xb6   :  { %v80_v23 = vadd.f32 %v79_v21, %v78_v22 }
  0xb8   :  { %82 = vst.msk [vmem:[#allocation6] sm:$0x3] %vm81_vm8, %v80_v23 }
  0xbf   :  { %v93_v24 = vld [vmem:[#allocation6] sm:$0x3] }
  0xc0   :  { %v95_v25 = vadd.f32 %v93_v24, %v45_v1 }
  0xc2   :  { %97 = vst.msk [vmem:[#allocation6] sm:$0x3] %vm96_vm5, %v95_v25 }
  0xfd   :  { %v88_v26 = vpop.permute.xlu1 %87 }
  0xfe   :  { %v90_v28 = vadd.f32 %v88_v26, %v83_v27 }
 0x100   :  { %92 = vst.msk [vmem:[#allocation6 + $0x6] sm:$0x3] %vm91_vm1, %v90_v28 }
 0x107   :  { %v98_v30 = vld [vmem:[#allocation6 + $0x6] sm:$0x3] }
 0x108   :  { %v101_v31 = vadd.f32 %v99_v29, %v98_v30 }
 0x10a   :  { %103 = vst.msk [vmem:[#allocation6 + $0x6] sm:$0x3] %vm102_vm3, %v101_v31 }
 0x111   :  { %v104_v32 = vld [vmem:[#allocation6] sm:$0xff] }
 0x112   :  { %v105_v33 = vmul.f32 0.2, %v104_v32 }
 0x114   :  { %v107_v34 = vsub.f32 %v249_v0, %v105_v33  ;;  %106 = vst [vmem:[#allocation6] sm:$0xff] %v105_v33 }
 0x115   :  { %177 = shalt.err (!%p174_p12)
}
 0x116   :  { %s178_s30 = scalar_lea.hbm %s300_s2, 128 }
 0x117   :  { %p179_p13 = scmp.ne.s32.totalorder %s300_s2, %s178_s30  ;;  %p182_p0 = scmp.lt.u32.totalorder %s178_s30, %s300_s2 }
 0x119   :  { %p184_p1 = pnand %p182_p0, %p179_p13 }
 0x11b   :  { %187 = shalt.err (!%p184_p1)
}
 0x11c   :  { %128 = dma.vmem_to_hbm [thread:$0]  %s126_s24, 128, %s300_s2, [#allocation7]   ;;  %108 = vst [vmem:[#allocation5] sm:$0xff] %v107_v34 }
 0x11d   :  { %s188_s9 = scalar_lea.vmem %s116_s26, 128  ;;  %p193_p3 = scmp.lt.s32.totalorder %s116_s26, %s116_s26 }
 0x11e   :  { %p189_p2 = scmp.ne.s32.totalorder %s116_s26, %s188_s9  ;;  %p194_p4 = scmp.lt.s32.totalorder %s188_s9, %s188_s9 }
 0x120   :  { %p195_p5 = por %p194_p4, %p193_p3 }
 0x122   :  { %p196_p6 = pnand %p195_p5, %p189_p2 }
 0x124   :  { %199 = shalt.err (!%p196_p6)
}
 0x125   :  { %s200_s12 = scalar_lea.hbm %s299_s1, 128 }
 0x126   :  { %p201_p7 = scmp.ne.s32.totalorder %s299_s1, %s200_s12  ;;  %p204_p8 = scmp.lt.u32.totalorder %s200_s12, %s299_s1 }
 0x128   :  { %p206_p9 = pnand %p204_p8, %p201_p7 }
 0x12a   :  { %209 = shalt.err (!%p206_p9)
}
 0x12b   :  { %118 = dma.vmem_to_hbm [thread:$0]  %s116_s26, 128, %s299_s1, [#allocation4]  }
 0x12c   :  { %212 = dma.done.wait [#allocation4], 128  }
 0x12d   :  { %213 = vsyncadd [#allocation4], 4294967168 }
 0x12e   :  { %214 = dma.done.wait [#allocation7], 128  }
 0x12f   :  { %215 = vsyncadd [#allocation7], 4294967168 }
 0x130   :  { %135 = vsyncpa [#allocation3], 1 }
 0x131   :  { %136 = vsyncpa [#allocation4], 1 }
 0x132   :  { %137 = vsyncpa [#allocation7], 1 }

</bundles_post_ra>
